<compile_context>
chip_gen: v7x
topology: tpu7x:2x2x1
jax: 0.10.0
libtpu: 0.0.40
codegen_flags: <defaults>
</compile_context>

<pallas_src>
import functools

import jax
import jax.numpy as jnp
from jax.experimental import pallas as pl
from jax.experimental.pallas import tpu as pltpu

NEG_SLOPE = 0.01          # F.leaky_relu default negative_slope
F_IN = 9                  # in_tabular_features
H1 = 200
H2 = 100
OUT = 3                   # out_quantiles
DEFAULT_TILE_B = 8192     # batch rows per grid step (lane axis); multiple of 128
VMEM_LIMIT_BYTES = 48 * 1024 * 1024


def _cdiv(a, b):
    return (a + b - 1) // b


def _round_up(x, m):
    return _cdiv(x, m) * m


def _leaky_relu(x):
    # max form: mul + max (2 VALU ops/elem) instead of cmp + select + mul.
    return jnp.maximum(x, NEG_SLOPE * x)


def _default_bf16_epilogue():
    """bf16 epilogue only on chips whose VPU has a bf16 path (v6e / v7x)."""
    try:
        kind = jax.devices()[0].device_kind.lower()
    except Exception:
        return False
    return ("v6" in kind) or ("v7" in kind)


def _choose_batch_tiling(batch, tile_b):
    """Pick (tile, padded_batch, n_steps) for the 1-D batch grid."""
    tb_req = max(128, _round_up(tile_b, 128))
    b128 = _round_up(max(batch, 1), 128)
    n_steps = _cdiv(b128, tb_req)
    # v7x megacore: prefer >= 2 grid steps whenever the batch allows it so the
    # "parallel" batch axis can be sharded across both TensorCores.
    if n_steps == 1 and b128 >= 256:
        n_steps = 2
    tb = _round_up(_cdiv(b128, n_steps), 128)
    return tb, n_steps * tb, n_steps


def quant_mlp_kernel(bf16_epilogue, x_ref, w1b_ref, w2_ref, b2_ref, w3_ref,
                     b3_ref, o_ref):
    """Feature-major fused MLP.

    x_ref  : (F_IN+1, TILE_B) bf16 -- batch on the lane axis; last row is ones
    w1b    : (H1, F_IN+1)     bf16 -- fc1 weight with bias folded as last col
    w2,w3  : (out, in)        bf16 -- PyTorch layout, VMEM-resident across grid
    b2,b3  : (out, 1)         f32
    o_ref  : (OUT, TILE_B)    bf16
    """
    ep = jnp.bfloat16 if bf16_epilogue else jnp.float32
    xT = x_ref[...]                                              # (10, TB) bf16

    # fc1 (bias folded into the matmul via the ones row) + LeakyReLU.
    h1 = jnp.dot(w1b_ref[...], xT, preferred_element_type=jnp.float32)
    h1 = _leaky_relu(h1.astype(ep)).astype(jnp.bfloat16)         # (200, TB)

    # fc2 + bias + LeakyReLU
    h2 = jnp.dot(w2_ref[...], h1, preferred_element_type=jnp.float32)
    h2 = _leaky_relu(h2.astype(ep) + b2_ref[...].astype(ep)).astype(jnp.bfloat16)

    # fc3 + bias (no activation)
    o = jnp.dot(w3_ref[...], h2, preferred_element_type=jnp.float32)
    o_ref[...] = (o.astype(ep) + b3_ref[...].astype(ep)).astype(o_ref.dtype)


def quant_model_forward(x, params, tile_b=DEFAULT_TILE_B, bf16_epilogue=None):
    """x: (B, F_IN) float32 -> (B, out_quantiles) float32."""
    if bf16_epilogue is None:
        bf16_epilogue = _default_bf16_epilogue()

    B, F = x.shape
    h1, f_in = params["w1"].shape
    h2 = params["w2"].shape[0]
    out_q = params["w3"].shape[0]
    assert F == f_in, (F, f_in)

    tb, B_pad, n_steps = _choose_batch_tiling(B, tile_b)

    # Present x feature-major, bf16, with a ones row (folds the fc1 bias into
    # the matmul) and zero-padded along batch.  Padded batch columns produce
    # junk output columns which are sliced off below.
    # TODO(synk): if the caller can hold x feature-major already, the
    # cast+pad+transpose wrapper pass can be dropped entirely.
    xb = jnp.concatenate(
        [x.astype(jnp.bfloat16), jnp.ones((B, 1), jnp.bfloat16)], axis=1)
    if B_pad != B:
        xb = jnp.pad(xb, ((0, B_pad - B), (0, 0)))
    xT = xb.T                                                    # (F_IN+1, B_pad)

    # fc1 weight with its (bf16) bias appended as an extra input column.
    w1b = jnp.concatenate(
        [params["w1"].astype(jnp.bfloat16),
         params["b1"].astype(jnp.bfloat16)], axis=1)             # (H1, F_IN+1)

    const = lambda i: (0, 0)   # weights/biases: single block, VMEM-resident

    weight_bytes = (2 * (h1 * (f_in + 1) + h2 * h1 + out_q * h2)
                    + 4 * (h2 + out_q))
    cost = pl.CostEstimate(
        flops=2 * B_pad * ((f_in + 1) * h1 + h1 * h2 + h2 * out_q),
        transcendentals=0,
        bytes_accessed=B_pad * ((f_in + 1) * 2 + out_q * 2) + weight_bytes,
    )

    kernel = functools.partial(quant_mlp_kernel, bf16_epilogue)

    out_T = pl.pallas_call(
        kernel,
        out_shape=jax.ShapeDtypeStruct((out_q, B_pad), jnp.bfloat16),
        grid_spec=pltpu.PrefetchScalarGridSpec(
            num_scalar_prefetch=0,
            grid=(n_steps,),
            in_specs=[
                pl.BlockSpec((f_in + 1, tb), lambda i: (0, i)),   # xT tile
                pl.BlockSpec((h1, f_in + 1), const),              # w1 (+bias)
                pl.BlockSpec((h2, h1), const),                    # w2
                pl.BlockSpec((h2, 1), const),                     # b2
                pl.BlockSpec((out_q, h2), const),                 # w3
                pl.BlockSpec((out_q, 1), const),                  # b3
            ],
            out_specs=pl.BlockSpec((out_q, tb), lambda i: (0, i)),
        ),
        compiler_params=pltpu.CompilerParams(
            dimension_semantics=("parallel",),
            vmem_limit_bytes=VMEM_LIMIT_BYTES),
        cost_estimate=cost,
    )(xT, w1b, params["w2"], params["b2"], params["w3"], params["b3"])

    return out_T[:, :B].T.astype(jnp.float32)                    # (B, out_q)


def init_params(key, in_tabular_features=F_IN, hidden1=H1, hidden2=H2,
                out_quantiles=OUT):
    """PyTorch-Linear-style init (uniform +/- 1/sqrt(fan_in)).

    Weights stored in PyTorch (out, in) layout as bf16; biases as (out, 1) f32.
    """
    ks = jax.random.split(key, 6)

    def lin(kw, kb, fan_in, fan_out):
        bound = 1.0 / float(fan_in) ** 0.5
        w = jax.random.uniform(kw, (fan_out, fan_in), jnp.float32, -bound, bound)
        b = jax.random.uniform(kb, (fan_out, 1), jnp.float32, -bound, bound)
        return w.astype(jnp.bfloat16), b

    w1, b1 = lin(ks[0], ks[1], in_tabular_features, hidden1)
    w2, b2 = lin(ks[2], ks[3], hidden1, hidden2)
    w3, b3 = lin(ks[4], ks[5], hidden2, out_quantiles)
    return {"w1": w1, "b1": b1, "w2": w2, "b2": b2, "w3": w3, "b3": b3}


def reference_forward(x, p, bf16_epilogue=None):
    """Pure-JAX reference following the same precision path as the kernel."""
    if bf16_epilogue is None:
        bf16_epilogue = _default_bf16_epilogue()
    ep = jnp.bfloat16 if bf16_epilogue else jnp.float32
    xb = x.astype(jnp.bfloat16)
    # fc1 bias enters the kernel's MXU in bf16 (folded column).
    b1 = p["b1"].astype(jnp.bfloat16).astype(jnp.float32)
    a1 = jnp.dot(xb, p["w1"].astype(jnp.bfloat16).T,
                 preferred_element_type=jnp.float32) + b1.T
    a1 = _leaky_relu(a1.astype(ep)).astype(jnp.bfloat16)
    a2 = jnp.dot(a1, p["w2"].astype(jnp.bfloat16).T,
                 preferred_element_type=jnp.float32)
    a2 = _leaky_relu(a2.astype(ep) + p["b2"].T.astype(ep)).astype(jnp.bfloat16)
    a3 = jnp.dot(a2, p["w3"].astype(jnp.bfloat16).T,
                 preferred_element_type=jnp.float32)
    out = (a3.astype(ep) + p["b3"].T.astype(ep)).astype(jnp.bfloat16)
    return out.astype(jnp.float32)


def reference_forward_f32(x, p):
    """Full-f32 reference of the original PyTorch QuantModel forward."""
    a1 = _leaky_relu(x @ p["w1"].astype(jnp.float32).T + p["b1"].T)
    a2 = _leaky_relu(a1 @ p["w2"].astype(jnp.float32).T + p["b2"].T)
    return a2 @ p["w3"].astype(jnp.float32).T + p["b3"].T


if __name__ == "__main__":
    key = jax.random.PRNGKey(0)
    k_x, k_p = jax.random.split(key)

    params = init_params(k_p)
    use_bf16_ep = _default_bf16_epilogue()

    # Small demo batch (single grid step).
    B = 8
    x = jax.random.normal(k_x, (B, F_IN), dtype=jnp.float32)
    out = jax.block_until_ready(quant_model_forward(x, params))
    ref = reference_forward(x, params, use_bf16_ep)
    ref32 = reference_forward_f32(x, params)
    assert out.shape == (B, OUT), out.shape
    assert jnp.allclose(out, ref, atol=2e-2, rtol=2e-2), "mismatch vs bf16-path ref (B=8)"
    assert jnp.allclose(out, ref32, atol=1e-1, rtol=1e-1), "mismatch vs f32 ref (B=8)"

    # Ragged batch, explicit small tile -> multi-step grid (exercises wrapper
    # padding, VMEM-resident weights across grid steps, parallel batch axis).
    B2 = 300
    x2 = jax.random.normal(k_x, (B2, F_IN), dtype=jnp.float32)
    out2 = jax.block_until_ready(quant_model_forward(x2, params, tile_b=128))
    ref2 = reference_forward(x2, params, use_bf16_ep)
    assert out2.shape == (B2, OUT), out2.shape
    assert jnp.allclose(out2, ref2, atol=2e-2, rtol=2e-2), "mismatch vs ref (B=300, tile=128)"

    # Same ragged batch with the default (large) tile: exercises the forced
    # >=2-step split used for v7x megacore sharding.
    out3 = jax.block_until_ready(quant_model_forward(x2, params))
    assert out3.shape == (B2, OUT), out3.shape
    assert jnp.allclose(out3, ref2, atol=2e-2, rtol=2e-2), "mismatch vs ref (B=300, default tile)"

    print("KERNEL_OK")
</pallas_src>

<mosaic_0001>
module attributes {stable_mosaic.version = 11 : i64} {
  func.func @quant_mlp_kernel(%arg0: i32, %arg1: memref<10x128xbf16, #tpu.memory_space<vmem>>, %arg2: memref<200x10xbf16, #tpu.memory_space<vmem>>, %arg3: memref<100x200xbf16, #tpu.memory_space<vmem>>, %arg4: memref<100x1xf32, #tpu.memory_space<vmem>>, %arg5: memref<3x100xbf16, #tpu.memory_space<vmem>>, %arg6: memref<3x1xf32, #tpu.memory_space<vmem>>, %arg7: memref<3x128xbf16, #tpu.memory_space<vmem>>) attributes {dimension_semantics = [#tpu.dimension_semantics<parallel>], iteration_bounds = array<i64: 1>, scalar_prefetch = 0 : i64, scratch_operands = 0 : i64, tpu.core_type = #tpu.core_type<tc>, window_params = [{transform_indices = @transform_0, window_bounds = array<i64: 10, 128>}, {pipeline_mode = #tpu.pipeline_mode<synchronous>, transform_indices = @transform_1, window_bounds = array<i64: 200, 10>}, {pipeline_mode = #tpu.pipeline_mode<synchronous>, transform_indices = @transform_2, window_bounds = array<i64: 100, 200>}, {pipeline_mode = #tpu.pipeline_mode<synchronous>, transform_indices = @transform_3, window_bounds = array<i64: 100, 1>}, {pipeline_mode = #tpu.pipeline_mode<synchronous>, transform_indices = @transform_4, window_bounds = array<i64: 3, 100>}, {pipeline_mode = #tpu.pipeline_mode<synchronous>, transform_indices = @transform_5, window_bounds = array<i64: 3, 1>}, {transform_indices = @transform_6, window_bounds = array<i64: 3, 128>}]} {
    %c0 = arith.constant 0 : index
    %c0_0 = arith.constant 0 : index
    %0 = vector.load %arg1[%c0, %c0_0] : memref<10x128xbf16, #tpu.memory_space<vmem>>, vector<10x128xbf16>
    %c0_1 = arith.constant 0 : index
    %c0_2 = arith.constant 0 : index
    %1 = vector.load %arg2[%c0_1, %c0_2] : memref<200x10xbf16, #tpu.memory_space<vmem>>, vector<200x10xbf16>
    %cst = arith.constant dense<0.000000e+00> : vector<200x128xf32>
    %2 = tpu.matmul %1, %0, %cst {dimension_numbers = #tpu.dot_dimension_numbers<[1], [0], [0], [1], [0, 0, 1, 1], [], []>} : vector<200x10xbf16>, vector<10x128xbf16>, vector<200x128xf32> -> vector<200x128xf32>
    %cst_3 = arith.constant 0.00999999977 : f32
    %3 = vector.broadcast %cst_3 : f32 to vector<200x128xf32>
    %4 = arith.mulf %3, %2 : vector<200x128xf32>
    %5 = arith.maximumf %2, %4 : vector<200x128xf32>
    %6 = arith.truncf %5 : vector<200x128xf32> to vector<200x128xbf16>
    %c0_4 = arith.constant 0 : index
    %c0_5 = arith.constant 0 : index
    %7 = vector.load %arg3[%c0_4, %c0_5] : memref<100x200xbf16, #tpu.memory_space<vmem>>, vector<100x200xbf16>
    %cst_6 = arith.constant dense<0.000000e+00> : vector<100x128xf32>
    %8 = tpu.matmul %7, %6, %cst_6 {dimension_numbers = #tpu.dot_dimension_numbers<[1], [0], [0], [1], [0, 0, 1, 1], [], []>} : vector<100x200xbf16>, vector<200x128xbf16>, vector<100x128xf32> -> vector<100x128xf32>
    %c0_7 = arith.constant 0 : index
    %c0_8 = arith.constant 0 : index
    %9 = vector.load %arg4[%c0_7, %c0_8] : memref<100x1xf32, #tpu.memory_space<vmem>>, vector<100x1xf32>
    %10 = vector.broadcast %9 : vector<100x1xf32> to vector<100x128xf32>
    %11 = arith.addf %8, %10 : vector<100x128xf32>
    %cst_9 = arith.constant 0.00999999977 : f32
    %12 = vector.broadcast %cst_9 : f32 to vector<100x128xf32>
    %13 = arith.mulf %12, %11 : vector<100x128xf32>
    %14 = arith.maximumf %11, %13 : vector<100x128xf32>
    %15 = arith.truncf %14 : vector<100x128xf32> to vector<100x128xbf16>
    %c0_10 = arith.constant 0 : index
    %c0_11 = arith.constant 0 : index
    %16 = vector.load %arg5[%c0_10, %c0_11] : memref<3x100xbf16, #tpu.memory_space<vmem>>, vector<3x100xbf16>
    %cst_12 = arith.constant dense<0.000000e+00> : vector<3x128xf32>
    %17 = tpu.matmul %16, %15, %cst_12 {dimension_numbers = #tpu.dot_dimension_numbers<[1], [0], [0], [1], [0, 0, 1, 1], [], []>} : vector<3x100xbf16>, vector<100x128xbf16>, vector<3x128xf32> -> vector<3x128xf32>
    %c0_13 = arith.constant 0 : index
    %c0_14 = arith.constant 0 : index
    %18 = vector.load %arg6[%c0_13, %c0_14] : memref<3x1xf32, #tpu.memory_space<vmem>>, vector<3x1xf32>
    %19 = vector.broadcast %18 : vector<3x1xf32> to vector<3x128xf32>
    %20 = arith.addf %17, %19 : vector<3x128xf32>
    %21 = arith.truncf %20 : vector<3x128xf32> to vector<3x128xbf16>
    %c0_15 = arith.constant 0 : index
    %c0_16 = arith.constant 0 : index
    %22 = vector.load %arg7[%c0_15, %c0_16] : memref<3x128xbf16, #tpu.memory_space<vmem>>, vector<3x128xbf16>
    tpu.vector_store %arg7[%c0_15, %c0_16], %21 {strides = array<i32>} : memref<3x128xbf16, #tpu.memory_space<vmem>>, vector<3x128xbf16>,
    return
  }
  func.func @transform_0(%arg0: i32) -> (i32, i32) {
    %c0_i32 = arith.constant 0 : i32
    %c0_i32_0 = arith.constant 0 : i32
    return %c0_i32, %arg0 : i32, i32
  }
  func.func @transform_1(%arg0: i32) -> (i32, i32) {
    %c0_i32 = arith.constant 0 : i32
    %c0_i32_0 = arith.constant 0 : i32
    %c0_i32_1 = arith.constant 0 : i32
    return %c0_i32, %c0_i32_0 : i32, i32
  }
  func.func @transform_2(%arg0: i32) -> (i32, i32) {
    %c0_i32 = arith.constant 0 : i32
    %c0_i32_0 = arith.constant 0 : i32
    %c0_i32_1 = arith.constant 0 : i32
    return %c0_i32, %c0_i32_0 : i32, i32
  }
  func.func @transform_3(%arg0: i32) -> (i32, i32) {
    %c0_i32 = arith.constant 0 : i32
    %c0_i32_0 = arith.constant 0 : i32
    %c0_i32_1 = arith.constant 0 : i32
    return %c0_i32, %c0_i32_0 : i32, i32
  }
  func.func @transform_4(%arg0: i32) -> (i32, i32) {
    %c0_i32 = arith.constant 0 : i32
    %c0_i32_0 = arith.constant 0 : i32
    %c0_i32_1 = arith.constant 0 : i32
    return %c0_i32, %c0_i32_0 : i32, i32
  }
  func.func @transform_5(%arg0: i32) -> (i32, i32) {
    %c0_i32 = arith.constant 0 : i32
    %c0_i32_0 = arith.constant 0 : i32
    %c0_i32_1 = arith.constant 0 : i32
    return %c0_i32, %c0_i32_0 : i32, i32
  }
  func.func @transform_6(%arg0: i32) -> (i32, i32) {
    %c0_i32 = arith.constant 0 : i32
    %c0_i32_0 = arith.constant 0 : i32
    return %c0_i32, %arg0 : i32, i32
  }
}

</mosaic_0001>

<bundles_post_ra>
// kernel: tpu_custom_call.1
= control target key start
LH: loop header
LB: loop body
LE: loop exit
PB: predicated region body
PF: predicated region fallthrough
CT: control target
= control target key end

     0   :  { %vm160_vm0 = vcmask 1044480   ;;  %v944_v0 = vmov 0.0   ;;  %vm945_vm1 = vmmov 0   ;;  %vm120_vm2 = vcmask 80896   ;;  %s1194_s0 = inlined_call_operand.vmem [shape: bf16[10,128], index: 0, kind: input, shape index: {}]   ;;  %s1195_s1 = inlined_call_operand.vmem [shape: bf16[200,10], index: 1, kind: input, shape index: {}]   ;;  %s1196_s2 = inlined_call_operand.vmem [shape: bf16[100,200], index: 2, kind: input, shape index: {}]   ;;  %s1197_s3 = inlined_call_operand.vmem [shape: f32[100,1], index: 3, kind: input, shape index: {}]   ;;  %s1198_s4 = inlined_call_operand.vmem [shape: bf16[3,100], index: 4, kind: input, shape index: {}]   ;;  %s1199_s5 = inlined_call_operand.vmem [shape: f32[3,1], index: 5, kind: input, shape index: {}]   ;;  %s1200_s6 = inlined_call_operand.hbm [shape: bf16[3,128], index: 6, kind: output, shape index: {}]  }
   0x1   :  { %808 = vmatprep.subr.bf16.mxu0 %v944_v0  ;;  %v886_v1 = vld [vmem:[%s1194_s0] sm:$0x1f]   ;;  %810 = vmatprep.mubr.msk.bf16.mxu0 %vm945_vm1, %v944_v0  ;;  %v888_v4 = vld [vmem:[%s1195_s1 + $0x8] sm:$0xff]  }
   0x2   :  { %v887_v2 = vld [vmem:[%s1195_s1] sm:$0xff]   ;;  %v162_v3 = vsel %vm160_vm0, %v886_v1, 0 }
   0x3   :  { %809 = vmatpush3.bf16.msra.mxu0 %v162_v3 }
   0x4   :  { %862 = vmatprep.subr.bf16.mxu0 %v944_v0 }
   0x6   :  { %811 = vmatmul.mubr.msk.bf16.vlgmr.msra.gmra.mrb[0].mxu0 %vm120_vm2, %v887_v2 }
   0x7   :  { %814 = vmatprep.mubr.msk.bf16.mxu0 %vm945_vm1, %v944_v0 }
   0xe   :  { %815 = vmatmul.mubr.msk.bf16.gmra.mrb[4].mxu0 %vm120_vm2, %v888_v4 }
   0xf   :  { %818 = vmatprep.mubr.msk.bf16.mxu0 %vm945_vm1, %v944_v0 }
  0x10   :  { %11 = vsyncpa [#allocation3], 0  ;;  %v889_v5 = vld [vmem:[%s1195_s1 + $0x10] sm:$0xff]   ;;  %v890_v6 = vld [vmem:[%s1195_s1 + $0x18] sm:$0xff]   ;;  %v946_v15 = vmov 0   ;;  %vm514_vm3 = vcmask 588800  }
  0x11   :  { %v891_v7 = vld [vmem:[%s1195_s1 + $0x20] sm:$0xff]   ;;  %v892_v8 = vld [vmem:[%s1195_s1 + $0x28] sm:$0xff]   ;;  %v893_v9 = vld [vmem:[%s1195_s1 + $0x30] sm:$0xff]   ;;  %540 = vmatprep.subr.bf16.mxu1 %v946_v15  ;;  %884 = vset.pattern.permute.xlu0 %v946_v15  ;;  %vm536_vm4 = vcmask 1043456   ;;  %vm672_vm5 = vcmask 1041408   ;;  %vm668_vm6 = vcmask 818176  }
  0x12   :  { %v894_v10 = vld [vmem:[%s1195_s1 + $0x38] sm:$0xff]   ;;  %v895_v11 = vld [vmem:[%s1195_s1 + $0x40] sm:$0xff]   ;;  %v896_v12 = vld [vmem:[%s1195_s1 + $0x48] sm:$0xff]   ;;  %885 = vset.pattern.permute.xlu1 %v946_v15  ;;  %vm718_vm7 = vsmask.f32 1280  ;;  %s947_s25 = smov [#allocation2]  }
  0x13   :  { %v897_v13 = vld [vmem:[%s1195_s1 + $0x50] sm:$0xff]   ;;  %v898_v14 = vld [vmem:[%s1195_s1 + $0x58] sm:$0xff]   ;;  %v899_v16 = vld [vmem:[%s1195_s1 + $0x60] ss:$0 sps:$4 sm:$0xff]   ;;  %s729_s1 = sshll.u32 %s947_s25, 4  ;;  %s730_s1 = int_to_ptr.vmem [resolvable:$true] %s729_s1 }
  0x14   :  { %v902_v17 = vld [vmem:[%s1196_s2 + $0x4] ss:$8 sps:$4 sm:$0xff]   ;;  %v378_v52 = vld [vmem:[%s1197_s3 + $0x10] sm:$0xff]  ;;  %v379_v56 = vld [vmem:[%s1197_s3 + $0x18] sm:$0xff]  ;;  %s920_s0 = scalar_lea.vmem %s730_s1, 32  ;;  %p925_p1 = scmp.lt.s32.totalorder %s730_s1, %s730_s1 }
  0x15   :  { %778 = vmatprep.mubr.msk.bf16.mxu1 %vm514_vm3, %v902_v17  ;;  %v376_v51 = vld [vmem:[%s1197_s3] sm:$0xff]  ;;  %v377_v55 = vld [vmem:[%s1197_s3 + $0x8] sm:$0xff]  ;;  %401 = vperm.xlu1 %885, %v378_v52   ;;  %vm719_vm8 = vmand %vm672_vm5, %vm718_vm7  ;;  %p921_p0 = scmp.ne.s32.totalorder %s730_s1, %s920_s0  ;;  %p926_p2 = scmp.lt.s32.totalorder %s920_s0, %s920_s0 }
  0x16   :  { %819 = vmatmul.mubr.msk.bf16.gmra.mrb[8].mxu0 %vm120_vm2, %v889_v5  ;;  %391 = vperm.xlu0 %884, %v376_v51   ;;  %v380_v61 = vld [vmem:[%s1197_s3 + $0x20] sm:$0xff]  ;;  %v381_v63 = vld [vmem:[%s1197_s3 + $0x28] sm:$0xff]  ;;  %v382_v5 = vld [vmem:[%s1197_s3 + $0x30] sm:$0xff] }
  0x17   :  { %822 = vmatprep.mubr.msk.bf16.mxu0 %vm945_vm1, %v944_v0  ;;  %p927_p3 = por %p926_p2, %p925_p1 }
  0x19   :  { %406 = vperm.xlu1 %885, %v379_v56   ;;  %p928_p4 = pnand %p927_p3, %p921_p0 }
  0x1a   :  { %396 = vperm.xlu0 %884, %v377_v55  }
  0x1d   :  { %416 = vperm.xlu1 %885, %v381_v63  }
  0x1e   :  { %823 = vmatmul.mubr.msk.bf16.gmra.mrb[12].mxu0 %vm120_vm2, %v890_v6  ;;  %411 = vperm.xlu0 %884, %v380_v61   ;;  %v383_v6 = vld [vmem:[%s1197_s3 + $0x38] sm:$0xff] }
  0x1f   :  { %826 = vmatprep.mubr.msk.bf16.mxu0 %vm945_vm1, %v944_v0 }
  0x21   :  { %426 = vperm.xlu1 %885, %v383_v6  }
  0x22   :  { %421 = vperm.xlu0 %884, %v382_v5  }
  0x26   :  { %827 = vmatmul.mubr.msk.bf16.gmra.mrb[16].mxu0 %vm120_vm2, %v891_v7 }
  0x27   :  { %830 = vmatprep.mubr.msk.bf16.mxu0 %vm945_vm1, %v944_v0 }
  0x2e   :  { %831 = vmatmul.mubr.msk.bf16.gmra.mrb[20].mxu0 %vm120_vm2, %v892_v8 }
  0x2f   :  { %834 = vmatprep.mubr.msk.bf16.mxu0 %vm945_vm1, %v944_v0 }
  0x36   :  { %835 = vmatmul.mubr.msk.bf16.gmra.mrb[24].mxu0 %vm120_vm2, %v893_v9 }
  0x37   :  { %838 = vmatprep.mubr.msk.bf16.mxu0 %vm945_vm1, %v944_v0 }
  0x3e   :  { %839 = vmatmul.mubr.msk.bf16.gmra.mrb[28].mxu0 %vm120_vm2, %v894_v10 }
  0x3f   :  { %842 = vmatprep.mubr.msk.bf16.mxu0 %vm945_vm1, %v944_v0 }
  0x46   :  { %843 = vmatmul.mubr.msk.bf16.gmra.mrb[32].mxu0 %vm120_vm2, %v895_v11  ;;  %v384_v11 = vld [vmem:[%s1197_s3 + $0x40] sm:$0xff] }
  0x47   :  { %846 = vmatprep.mubr.msk.bf16.mxu0 %vm945_vm1, %v944_v0  ;;  %431 = vperm.xlu0 %884, %v384_v11  }
  0x4e   :  { %847 = vmatmul.mubr.msk.bf16.gmra.mrb[36].mxu0 %vm120_vm2, %v896_v12 }
  0x4f   :  { %850 = vmatprep.mubr.msk.bf16.mxu0 %vm945_vm1, %v944_v0 }
  0x56   :  { %851 = vmatmul.mubr.msk.bf16.gmra.mrb[40].mxu0 %vm120_vm2, %v897_v13  ;;  %v385_v13 = vld [vmem:[%s1197_s3 + $0x48] sm:$0xff] }
  0x57   :  { %854 = vmatprep.mubr.msk.bf16.mxu0 %vm945_vm1, %v944_v0  ;;  %436 = vperm.xlu1 %885, %v385_v13  }
  0x5e   :  { %855 = vmatmul.mubr.msk.bf16.gmra.mrb[44].mxu0 %vm120_vm2, %v898_v14 }
  0x5f   :  { %858 = vmatprep.mubr.msk.bf16.mxu0 %vm945_vm1, %v944_v0 }
  0x66   :  { %859 = vmatmul.mubr.msk.bf16.gmra.mrb[48].mxu0 %vm120_vm2, %v899_v16 }
  0x67   :  { %876 = vmatprep.mubr.msk.bf16.mxu0 %vm945_vm1, %v944_v0 }
  0xd9   :  { %v198_v18 = vpop.f32.mrb[0].mxu0 }
  0xda   :  { %v300_v19 = vmul.f32 0.01, %v198_v18  ;;  %v812_v20 = vpop.f32.mrb[1].mxu0 }
  0xdb   :  { %v201_v21 = vpop.f32.mrb[2].mxu0  ;;  %v387_v20 = vld [vmem:[%s1197_s3 + $0x58] sm:$0xff] }
  0xdc   :  { %v301_v22 = vmul.f32 0.01, %v201_v21  ;;  %v813_v23 = vpop.f32.mrb[3].mxu0  ;;  %v325_v24 = vmax.f32 %v198_v18, %v300_v19  ;;  %v386_v19 = vld [vmem:[%s1197_s3 + $0x50] sm:$0xff]  ;;  %446 = vperm.xlu1 %885, %v387_v20  }
  0xdd   :  { %441 = vperm.xlu0 %884, %v386_v19  }
  0xde   :  { %v326_v25 = vmax.f32 %v201_v21, %v301_v22 }
  0xe0   :  { %v350_v26 = vpack.c.bf16 %v326_v25, %v325_v24  ;;  %v388_v25 = vld [vmem:[%s1197_s3 + $0x60] sm:$0xf] }
  0xe1   :  { %v206_v27 = vpop.f32.mrb[4].mxu0  ;;  %451 = vperm.xlu0 %884, %v388_v25   ;;  %v903_v25 = vld [vmem:[%s1196_s2 + $0x14] ss:$8 sps:$4 sm:$0xff]  }
  0xe2   :  { %v302_v28 = vmul.f32 0.01, %v206_v27  ;;  %v816_v29 = vpop.f32.mrb[5].mxu0  ;;  %541 = vmatpush1.bf16.msra.mxu1 %v350_v26 }
  0xe3   :  { %v209_v30 = vpop.f32.mrb[6].mxu0  ;;  %542 = vmatprep.subr.bf16.mxu1 %v946_v15 }
  0xe4   :  { %v303_v31 = vmul.f32 0.01, %v209_v30  ;;  %v817_v32 = vpop.f32.mrb[7].mxu0  ;;  %v327_v33 = vmax.f32 %v206_v27, %v302_v28  ;;  %v662_v27 = vld [vmem:[%s1199_s5] sm:$0x7] }
  0xe5   :  { %665 = vperm.xlu1 %885, %v662_v27   ;;  %v908_v27 = vld [vmem:[%s1196_s2 + $0x20] ss:$8 sps:$4 sm:$0xff]  }
  0xe6   :  { %v328_v34 = vmax.f32 %v209_v30, %v303_v31 }
  0xe8   :  { %v351_v35 = vpack.c.bf16 %v328_v34, %v327_v33 }
  0xe9   :  { %v214_v36 = vpop.f32.mrb[8].mxu0 }
  0xea   :  { %v304_v37 = vmul.f32 0.01, %v214_v36  ;;  %v820_v38 = vpop.f32.mrb[9].mxu0  ;;  %543 = vmatpush1.bf16.msra.mxu1 %v351_v35 }
  0xeb   :  { %v217_v39 = vpop.f32.mrb[10].mxu0  ;;  %544 = vmatprep.subr.bf16.mxu1 %v946_v15 }
  0xec   :  { %v305_v40 = vmul.f32 0.01, %v217_v39  ;;  %v821_v41 = vpop.f32.mrb[11].mxu0  ;;  %v329_v42 = vmax.f32 %v214_v36, %v304_v37 }
  0xee   :  { %v330_v43 = vmax.f32 %v217_v39, %v305_v40 }
  0xf0   :  { %v352_v44 = vpack.c.bf16 %v330_v43, %v329_v42 }
  0xf1   :  { %v222_v45 = vpop.f32.mrb[12].mxu0 }
  0xf2   :  { %v306_v46 = vmul.f32 0.01, %v222_v45  ;;  %v824_v47 = vpop.f32.mrb[13].mxu0  ;;  %545 = vmatpush1.bf16.msra.mxu1 %v352_v44 }
  0xf3   :  { %v225_v48 = vpop.f32.mrb[14].mxu0  ;;  %546 = vmatprep.subr.bf16.mxu1 %v946_v15 }
  0xf4   :  { %v307_v49 = vmul.f32 0.01, %v225_v48  ;;  %v825_v50 = vpop.f32.mrb[15].mxu0  ;;  %v331_v53 = vmax.f32 %v222_v45, %v306_v46 }
  0xf6   :  { %v332_v54 = vmax.f32 %v225_v48, %v307_v49 }
  0xf8   :  { %v353_v57 = vpack.c.bf16 %v332_v54, %v331_v53 }
  0xf9   :  { %v230_v58 = vpop.f32.mrb[16].mxu0 }
  0xfa   :  { %v308_v59 = vmul.f32 0.01, %v230_v58  ;;  %v828_v60 = vpop.f32.mrb[17].mxu0  ;;  %547 = vmatpush1.bf16.msra.mxu1 %v353_v57 }
  0xfb   :  { %v233_v62 = vpop.f32.mrb[18].mxu0  ;;  %548 = vmatprep.subr.bf16.mxu1 %v946_v15 }
  0xfc   :  { %v309_v1 = vmul.f32 0.01, %v233_v62  ;;  %v829_v2 = vpop.f32.mrb[19].mxu0  ;;  %v333_v3 = vmax.f32 %v230_v58, %v308_v59 }
  0xfe   :  { %v334_v4 = vmax.f32 %v233_v62, %v309_v1 }
 0x100   :  { %v354_v7 = vpack.c.bf16 %v334_v4, %v333_v3 }
 0x101   :  { %v238_v8 = vpop.f32.mrb[20].mxu0 }
 0x102   :  { %v310_v9 = vmul.f32 0.01, %v238_v8  ;;  %v832_v10 = vpop.f32.mrb[21].mxu0  ;;  %549 = vmatpush1.bf16.msra.mxu1 %v354_v7 }
 0x103   :  { %v241_v12 = vpop.f32.mrb[22].mxu0  ;;  %550 = vmatprep.subr.bf16.mxu1 %v946_v15 }
 0x104   :  { %v311_v14 = vmul.f32 0.01, %v241_v12  ;;  %v833_v16 = vpop.f32.mrb[23].mxu0  ;;  %v335_v17 = vmax.f32 %v238_v8, %v310_v9 }
 0x106   :  { %v336_v18 = vmax.f32 %v241_v12, %v311_v14 }
 0x108   :  { %v355_v21 = vpack.c.bf16 %v336_v18, %v335_v17 }
 0x109   :  { %v246_v22 = vpop.f32.mrb[24].mxu0 }
 0x10a   :  { %v312_v23 = vmul.f32 0.01, %v246_v22  ;;  %v836_v24 = vpop.f32.mrb[25].mxu0  ;;  %551 = vmatpush1.bf16.msra.mxu1 %v355_v21 }
 0x10b   :  { %v249_v26 = vpop.f32.mrb[26].mxu0  ;;  %552 = vmatprep.subr.bf16.mxu1 %v946_v15  ;;  %v900_v24 = vld [vmem:[%s1196_s2] ss:$8 sps:$4 sm:$0xff]  }
 0x10c   :  { %v313_v28 = vmul.f32 0.01, %v249_v26  ;;  %v837_v29 = vpop.f32.mrb[27].mxu0  ;;  %v337_v30 = vmax.f32 %v246_v22, %v312_v23 }
 0x10d   :  { %v911_v29 = vld [vmem:[%s1196_s2 + $0x30] ss:$8 sps:$4 sm:$0xff]  }
 0x10e   :  { %v338_v31 = vmax.f32 %v249_v26, %v313_v28  ;;  %v906_v26 = vld [vmem:[%s1196_s2 + $0x24] ss:$8 sps:$4 sm:$0xff]   ;;  %v909_v28 = vld [vmem:[%s1196_s2 + $0x34] ss:$8 sps:$4 sm:$0xff]  }
 0x110   :  { %v356_v32 = vpack.c.bf16 %v338_v31, %v337_v30  ;;  %v912_v30 = vld [vmem:[%s1196_s2 + $0x44] ss:$8 sps:$4 sm:$0xff]   ;;  %v914_v31 = vld [vmem:[%s1196_s2 + $0x40] ss:$8 sps:$4 sm:$0xff]  }
 0x111   :  { %v254_v33 = vpop.f32.mrb[28].mxu0 }
 0x112   :  { %v314_v34 = vmul.f32 0.01, %v254_v33  ;;  %v840_v35 = vpop.f32.mrb[29].mxu0  ;;  %553 = vmatpush1.bf16.msra.mxu1 %v356_v32  ;;  %v915_v32 = vld [vmem:[%s1196_s2 + $0x54] ss:$8 sps:$4 sm:$0xff]  }
 0x113   :  { %v257_v36 = vpop.f32.mrb[30].mxu0  ;;  %554 = vmatprep.subr.bf16.mxu1 %v946_v15 }
 0x114   :  { %v315_v37 = vmul.f32 0.01, %v257_v36  ;;  %v841_v38 = vpop.f32.mrb[31].mxu0  ;;  %v339_v39 = vmax.f32 %v254_v33, %v314_v34  ;;  %v375_v33 = vld [vmem:[%s1196_s2 + $0x60] sm:$0x33] }
 0x115   :  { %v917_v34 = vld [vmem:[%s1196_s2 + $0x50] ss:$8 sps:$4 sm:$0xff]   ;;  %v777_v35 = vcombine.high %v375_v33, %v375_v33 }
 0x116   :  { %v340_v40 = vmax.f32 %v257_v36, %v315_v37  ;;  %v776_v36 = vcombine.low %v375_v33, %v375_v33  ;;  %v392_v37 = vpop.permute.xlu0 %391 }
 0x118   :  { %v357_v41 = vpack.c.bf16 %v340_v40, %v339_v39 }
 0x119   :  { %v262_v42 = vpop.f32.mrb[32].mxu0 }
 0x11a   :  { %v316_v43 = vmul.f32 0.01, %v262_v42  ;;  %v844_v44 = vpop.f32.mrb[33].mxu0  ;;  %555 = vmatpush1.bf16.msra.mxu1 %v357_v41  ;;  %v397_v38 = vpop.permute.xlu0 %396 }
 0x11b   :  { %v265_v45 = vpop.f32.mrb[34].mxu0  ;;  %556 = vmatprep.subr.bf16.mxu1 %v946_v15 }
 0x11c   :  { %v317_v46 = vmul.f32 0.01, %v265_v45  ;;  %v845_v47 = vpop.f32.mrb[35].mxu0  ;;  %v341_v48 = vmax.f32 %v262_v42, %v316_v43 }
 0x11e   :  { %v342_v49 = vmax.f32 %v265_v45, %v317_v46  ;;  %v402_v46 = vpop.permute.xlu1 %401 }
 0x120   :  { %v358_v50 = vpack.c.bf16 %v342_v49, %v341_v48 }
 0x121   :  { %v270_v51 = vpop.f32.mrb[36].mxu0 }
 0x122   :  { %v318_v52 = vmul.f32 0.01, %v270_v51  ;;  %v848_v53 = vpop.f32.mrb[37].mxu0  ;;  %557 = vmatpush1.bf16.msra.mxu1 %v358_v50 }
 0x123   :  { %v273_v54 = vpop.f32.mrb[38].mxu0  ;;  %558 = vmatprep.subr.bf16.mxu1 %v946_v15 }
 0x124   :  { %v319_v55 = vmul.f32 0.01, %v273_v54  ;;  %v849_v56 = vpop.f32.mrb[39].mxu0  ;;  %v343_v57 = vmax.f32 %v270_v51, %v318_v52 }
 0x126   :  { %v344_v58 = vmax.f32 %v273_v54, %v319_v55  ;;  %v407_v54 = vpop.permute.xlu1 %406 }
 0x128   :  { %v359_v59 = vpack.c.bf16 %v344_v58, %v343_v57 }
 0x129   :  { %v278_v60 = vpop.f32.mrb[40].mxu0 }
 0x12a   :  { %v320_v61 = vmul.f32 0.01, %v278_v60  ;;  %v852_v62 = vpop.f32.mrb[41].mxu0  ;;  %559 = vmatpush1.bf16.msra.mxu1 %v359_v59 }
 0x12b   :  { %v281_v63 = vpop.f32.mrb[42].mxu0  ;;  %560 = vmatprep.subr.bf16.mxu1 %v946_v15  ;;  %v412_v62 = vpop.permute.xlu0 %411 }
 0x12c   :  { %v321_v1 = vmul.f32 0.01, %v281_v63  ;;  %v853_v2 = vpop.f32.mrb[43].mxu0  ;;  %v345_v3 = vmax.f32 %v278_v60, %v320_v61 }
 0x12e   :  { %v346_v4 = vmax.f32 %v281_v63, %v321_v1 }
 0x130   :  { %v360_v5 = vpack.c.bf16 %v346_v4, %v345_v3  ;;  %v417_v4 = vpop.permute.xlu1 %416 }
 0x131   :  { %v286_v6 = vpop.f32.mrb[44].mxu0 }
 0x132   :  { %v322_v7 = vmul.f32 0.01, %v286_v6  ;;  %v856_v8 = vpop.f32.mrb[45].mxu0  ;;  %561 = vmatpush1.bf16.msra.mxu1 %v360_v5 }
 0x133   :  { %v289_v9 = vpop.f32.mrb[46].mxu0  ;;  %562 = vmatprep.subr.bf16.mxu1 %v946_v15 }
 0x134   :  { %v323_v10 = vmul.f32 0.01, %v289_v9  ;;  %v857_v11 = vpop.f32.mrb[47].mxu0  ;;  %v347_v12 = vmax.f32 %v286_v6, %v322_v7 }
 0x136   :  { %v348_v13 = vmax.f32 %v289_v9, %v323_v10 }
 0x138   :  { %v361_v14 = vpack.c.bf16 %v348_v13, %v347_v12  ;;  %v422_v12 = vpop.permute.xlu0 %421 }
 0x139   :  { %v294_v16 = vpop.f32.mrb[48].mxu0 }
 0x13a   :  { %v324_v17 = vmul.f32 0.01, %v294_v16  ;;  %v860_v18 = vpop.f32.mrb[49].mxu0  ;;  %563 = vmatpush1.bf16.msra.mxu1 %v361_v14 }
 0x13b   :  { %v297_v19 = vpop.f32.mrb[50].mxu0  ;;  %564 = vmatprep.subr.bf16.mxu1 %v946_v15  ;;  %v905_v15 = vld [vmem:[%s1196_s2 + $0x10] ss:$8 sps:$4 sm:$0xff]   ;;  %v427_v18 = vpop.permute.xlu1 %426 }
 0x13c   :  { %v349_v20 = vmax.f32 %v294_v16, %v324_v17  ;;  %v861_v21 = vpop.f32.mrb[51].mxu0 }
 0x13e   :  { %v362_v22 = vpack.c.bf16 %v349_v20, %v349_v20 }
 0x140   :  { %v538_v23 = vsel %vm536_vm4, %v362_v22, 0 }
 0x141   :  { %565 = vmatpush1.bf16.msra.mxu1 %v538_v23 }
 0x144   :  { %573 = vmatmul.mubr.bf16.vlgmr.msra.gmra.mrb[0].mxu1 %v900_v24 }
 0x145   :  { %779 = vmatprep.mubr.msk.bf16.mxu1 %vm514_vm3, %v903_v25 }
 0x14c   :  { %581 = vmatmul.mubr.bf16.gmra.mrb[4].mxu1 %v905_v15  ;;  %v432_v15 = vpop.permute.xlu0 %431 }
 0x14d   :  { %780 = vmatprep.mubr.msk.bf16.mxu1 %vm514_vm3, %v906_v26 }
 0x154   :  { %589 = vmatmul.mubr.bf16.gmra.mrb[8].mxu1 %v908_v27 }
 0x155   :  { %781 = vmatprep.mubr.msk.bf16.mxu1 %vm514_vm3, %v909_v28 }
 0x15c   :  { %597 = vmatmul.mubr.bf16.gmra.mrb[12].mxu1 %v911_v29 }
 0x15d   :  { %782 = vmatprep.mubr.msk.bf16.mxu1 %vm514_vm3, %v912_v30  ;;  %v437_v30 = vpop.permute.xlu1 %436 }
 0x164   :  { %605 = vmatmul.mubr.bf16.gmra.mrb[16].mxu1 %v914_v31 }
 0x165   :  { %783 = vmatprep.mubr.msk.bf16.mxu1 %vm514_vm3, %v915_v32 }
 0x16c   :  { %613 = vmatmul.mubr.bf16.gmra.mrb[20].mxu1 %v917_v34 }
 0x16d   :  { %784 = vmatprep.mubr.msk.bf16.mxu1 %vm514_vm3, %v777_v35 }
 0x174   :  { %621 = vmatmul.mubr.bf16.gmra.mrb[24].mxu1 %v776_v36 }
 0x217   :  { %v574_v39 = vpop.f32.mrb[0].mxu1 }
 0x218   :  { %v575_v40 = vadd.f32 %v574_v39, %v392_v37  ;;  %v576_v41 = vpop.f32.mrb[1].mxu1 }
 0x219   :  { %v577_v42 = vpop.f32.mrb[2].mxu1 }
 0x21a   :  { %v628_v43 = vmul.f32 0.01, %v575_v40  ;;  %v578_v44 = vadd.f32 %v577_v42, %v397_v38  ;;  %v579_v45 = vpop.f32.mrb[3].mxu1  ;;  %v442_v38 = vpop.permute.xlu0 %441 }
 0x21c   :  { %v629_v47 = vmul.f32 0.01, %v578_v44  ;;  %v641_v48 = vmax.f32 %v575_v40, %v628_v43  ;;  %v447_v43 = vpop.permute.xlu1 %446 }
 0x21e   :  { %v642_v49 = vmax.f32 %v578_v44, %v629_v47 }
 0x21f   :  { %v582_v50 = vpop.f32.mrb[4].mxu1 }
 0x220   :  { %v654_v51 = vpack.c.bf16 %v642_v49, %v641_v48  ;;  %v583_v52 = vadd.f32 %v582_v50, %v402_v46  ;;  %v584_v53 = vpop.f32.mrb[5].mxu1 }
 0x221   :  { %v585_v55 = vpop.f32.mrb[6].mxu1 }
 0x222   :  { %v630_v56 = vmul.f32 0.01, %v583_v52  ;;  %v586_v57 = vadd.f32 %v585_v55, %v407_v54  ;;  %863 = vmatpush3.bf16.msra.mxu0 %v654_v51  ;;  %v587_v58 = vpop.f32.mrb[7].mxu1  ;;  %v452_v51 = vpop.permute.xlu0 %451 }
 0x223   :  { %864 = vmatprep.subr.bf16.mxu0 %v944_v0 }
 0x224   :  { %v631_v59 = vmul.f32 0.01, %v586_v57  ;;  %v643_v60 = vmax.f32 %v583_v52, %v630_v56 }
 0x226   :  { %v644_v61 = vmax.f32 %v586_v57, %v631_v59 }
 0x227   :  { %v590_v63 = vpop.f32.mrb[8].mxu1 }
 0x228   :  { %v655_v1 = vpack.c.bf16 %v644_v61, %v643_v60  ;;  %v591_v2 = vadd.f32 %v590_v63, %v412_v62  ;;  %v592_v3 = vpop.f32.mrb[9].mxu1  ;;  %v661_v62 = vld [vmem:[%s1198_s4] sm:$0x3]  ;;  %v666_v63 = vpop.permute.xlu1 %665 }
 0x229   :  { %v593_v5 = vpop.f32.mrb[10].mxu1 }
 0x22a   :  { %v632_v6 = vmul.f32 0.01, %v591_v2  ;;  %v594_v7 = vadd.f32 %v593_v5, %v417_v4  ;;  %865 = vmatpush3.bf16.msra.mxu0 %v655_v1  ;;  %v595_v8 = vpop.f32.mrb[11].mxu1  ;;  %v720_v4 = vld [vmem:[#allocation2] sm:$0x3] }
 0x22b   :  { %866 = vmatprep.subr.bf16.mxu0 %v944_v0 }
 0x22c   :  { %v633_v9 = vmul.f32 0.01, %v594_v7  ;;  %v645_v10 = vmax.f32 %v591_v2, %v632_v6 }
 0x22e   :  { %v646_v11 = vmax.f32 %v594_v7, %v633_v9 }
 0x22f   :  { %v598_v13 = vpop.f32.mrb[12].mxu1 }
 0x230   :  { %v656_v14 = vpack.c.bf16 %v646_v11, %v645_v10  ;;  %v599_v16 = vadd.f32 %v598_v13, %v422_v12  ;;  %v600_v17 = vpop.f32.mrb[13].mxu1 }
 0x231   :  { %v601_v19 = vpop.f32.mrb[14].mxu1 }
 0x232   :  { %v634_v20 = vmul.f32 0.01, %v599_v16  ;;  %v602_v21 = vadd.f32 %v601_v19, %v427_v18  ;;  %867 = vmatpush3.bf16.msra.mxu0 %v656_v14  ;;  %v603_v22 = vpop.f32.mrb[15].mxu1 }
 0x233   :  { %868 = vmatprep.subr.bf16.mxu0 %v944_v0 }
 0x234   :  { %v635_v23 = vmul.f32 0.01, %v602_v21  ;;  %v647_v24 = vmax.f32 %v599_v16, %v634_v20 }
 0x236   :  { %v648_v25 = vmax.f32 %v602_v21, %v635_v23 }
 0x237   :  { %v606_v26 = vpop.f32.mrb[16].mxu1 }
 0x238   :  { %v657_v27 = vpack.c.bf16 %v648_v25, %v647_v24  ;;  %v607_v28 = vadd.f32 %v606_v26, %v432_v15  ;;  %v608_v29 = vpop.f32.mrb[17].mxu1 }
 0x239   :  { %v609_v31 = vpop.f32.mrb[18].mxu1 }
 0x23a   :  { %v636_v32 = vmul.f32 0.01, %v607_v28  ;;  %v610_v33 = vadd.f32 %v609_v31, %v437_v30  ;;  %869 = vmatpush3.bf16.msra.mxu0 %v657_v27  ;;  %v611_v34 = vpop.f32.mrb[19].mxu1 }
 0x23b   :  { %870 = vmatprep.subr.bf16.mxu0 %v944_v0 }
 0x23c   :  { %v637_v35 = vmul.f32 0.01, %v610_v33  ;;  %v649_v36 = vmax.f32 %v607_v28, %v636_v32 }
 0x23e   :  { %v650_v37 = vmax.f32 %v610_v33, %v637_v35 }
 0x23f   :  { %v614_v39 = vpop.f32.mrb[20].mxu1 }
 0x240   :  { %v658_v40 = vpack.c.bf16 %v650_v37, %v649_v36  ;;  %v615_v41 = vadd.f32 %v614_v39, %v442_v38  ;;  %v616_v42 = vpop.f32.mrb[21].mxu1 }
 0x241   :  { %v617_v44 = vpop.f32.mrb[22].mxu1 }
 0x242   :  { %v638_v45 = vmul.f32 0.01, %v615_v41  ;;  %v618_v46 = vadd.f32 %v617_v44, %v447_v43  ;;  %871 = vmatpush3.bf16.msra.mxu0 %v658_v40  ;;  %v619_v47 = vpop.f32.mrb[23].mxu1 }
 0x243   :  { %872 = vmatprep.subr.bf16.mxu0 %v944_v0 }
 0x244   :  { %v639_v48 = vmul.f32 0.01, %v618_v46  ;;  %v651_v49 = vmax.f32 %v615_v41, %v638_v45 }
 0x246   :  { %v652_v50 = vmax.f32 %v618_v46, %v639_v48 }
 0x247   :  { %v622_v52 = vpop.f32.mrb[24].mxu1 }
 0x248   :  { %v659_v53 = vpack.c.bf16 %v652_v50, %v651_v49  ;;  %v623_v54 = vadd.f32 %v622_v52, %v452_v51  ;;  %v624_v55 = vpop.f32.mrb[25].mxu1 }
 0x249   :  { %v625_v56 = vpop.f32.mrb[26].mxu1 }
 0x24a   :  { %v640_v57 = vmul.f32 0.01, %v623_v54  ;;  %873 = vmatpush3.bf16.msra.mxu0 %v659_v53  ;;  %v626_v58 = vpop.f32.mrb[27].mxu1 }
 0x24b   :  { %874 = vmatprep.subr.bf16.mxu0 %v944_v0 }
 0x24c   :  { %v653_v59 = vmax.f32 %v623_v54, %v640_v57 }
 0x24e   :  { %v660_v60 = vpack.c.bf16 %v653_v59, %v653_v59 }
 0x250   :  { %v674_v61 = vsel %vm672_vm5, %v660_v60, 0 }
 0x251   :  { %875 = vmatpush3.bf16.msra.mxu0 %v674_v61 }
 0x254   :  { %877 = vmatmul.mubr.msk.bf16.vlgmr.msra.gmra.mrb[52].mxu0 %vm668_vm6, %v661_v62 }
 0x327   :  { %v710_v1 = vpop.f32.mrb[52].mxu0 }
 0x328   :  { %v711_v2 = vadd.f32 %v710_v1, %v666_v63  ;;  %v878_v3 = vpop.f32.mrb[53].mxu0 }
 0x329   :  { %v713_v0 = vpop.f32.mrb[54].mxu0 }
 0x32a   :  { %v716_v5 = vpack.c.bf16 %v711_v2, %v711_v2  ;;  %v879_v6 = vpop.f32.mrb[55].mxu0 }
 0x32c   :  { %v721_v7 = vsel %vm719_vm8, %v716_v5, %v720_v4 }
 0x32d   :  { %722 = vst [vmem:[#allocation2] sm:$0x3] %v721_v7 }
 0x32e   :  { %931 = shalt.err (!%p928_p4)
}
 0x32f   :  { %s932_s5 = scalar_lea.hbm %s1200_s6, 32 }
 0x330   :  { %p933_p5 = scmp.ne.s32.totalorder %s1200_s6, %s932_s5  ;;  %p936_p6 = scmp.lt.u32.totalorder %s932_s5, %s1200_s6 }
 0x332   :  { %p938_p7 = pnand %p936_p6, %p933_p5 }
 0x334   :  { %941 = shalt.err (!%p938_p7)
}
 0x335   :  { %732 = dma.vmem_to_hbm [thread:$0]  %s730_s1, 32, %s1200_s6, [#allocation3]  }
 0x336   :  { %942 = dma.done.wait [#allocation3], 32  }
 0x337   :  { %943 = vsyncadd [#allocation3], 4294967264 }
 0x338   :  { %736 = vsyncpa [#allocation3], 1 }

</bundles_post_ra>
